<compile_context>
chip_gen: v5e
topology: v5e:2x2
jax: 0.10.0
libtpu: 0.0.40
codegen_flags: <defaults>
</compile_context>

<pallas_src>
import numpy as np
import jax
import jax.numpy as jnp
from jax.experimental import pallas as pl
from jax.experimental.pallas import tpu as pltpu

# ----- config constants (consistent with the module) -----
Z_DIM = 16                      # LAYER_1_EMBEDDING_DIM
OUT_SIZE = 8                    # LAYER_1_OUT_DIM
UNIT_DIM = 40                   # sinusoid hidden width (unit_weight_vec_size)
N_EMB = UNIT_DIM // OUT_SIZE    # 5 embeddings
HIDDEN = 40
GEN_K = OUT_SIZE * Z_DIM        # 128: contraction dim of the generation matmul

# generated flat vector exactly fills the (40,40) middle weight; the block-diag
# generation trick below depends on these (breaks if e.g. USE_MIXED_LAYER).
assert N_EMB * OUT_SIZE * UNIT_DIM == HIDDEN * HIDDEN
assert UNIT_DIM == HIDDEN

MAX_BATCH_TILE = 1024           # lane-dense batch tile cap (multiple of 128)


# ---------------------------------------------------------------------------
# Fused kernel: hypernet weight generation + 3-layer MLP, batch on lanes.
#
#   gw[r,k] = sum_z emb[r//8, z] * hyper_w[(r%8)*40 + k, z] + hyper_b[(r%8)*40 + k]
#           = (E @ W)[r,k] + B[r,k]
# with E[r, c*16+z] = emb[r//8, z] * [c == r%8]   (block-diagonal, built in wrapper)
#      W[c*16+z, k] = hyper_w[c*40+k, z]          (permute, built in wrapper)
#      B[r, k]      = hyper_b[(r%8)*40 + k]
#
#   h0 = relu(w0 * x + b0)        (40, BT)   VPU broadcast (layer 0, 1 -> 40)
#   h1 = relu(gw @ h0 + b1)       (40, BT)   one MXU matmul (generated layer)
#   y  = w2 @ h1 + b2             (1,  BT)   one MXU matmul (layer 2, 40 -> 1)
# ---------------------------------------------------------------------------
def fused_indirect_kernel(x_ref, e_ref, w_ref, hb_ref, vec_ref, w2_ref, b2_ref, o_ref):
    x = x_ref[...]                                            # (1, BT) batch on lanes
    vec = vec_ref[...]                                        # (40, 3) cols: w0, b0, b1
    w0 = vec[:, 0:1]                                          # (40, 1)
    b0 = vec[:, 1:2]                                          # (40, 1)
    b1 = vec[:, 2:3]                                          # (40, 1)

    # hypernet generation: one MXU push + bias add
    gw = jnp.dot(e_ref[...], w_ref[...],
                 preferred_element_type=jnp.float32) + hb_ref[...]          # (40, 40)

    # layer 0 (not_generated, 1 -> 40): contraction dim == 1 -> broadcast multiply
    h0 = jnp.maximum(w0 * x + b0, 0.0)                                      # (40, BT)

    # layer 1 (generated, 40 -> 40): single matmul, bias + relu
    h1 = jnp.maximum(jnp.dot(gw, h0, preferred_element_type=jnp.float32) + b1,
                     0.0)                                                   # (40, BT)

    # layer 2 (not_generated, 40 -> 1): single matmul, lane-dense (1, BT) output
    y = jnp.dot(w2_ref[...], h1, preferred_element_type=jnp.float32)        # (1, BT)
    o_ref[...] = y + b2_ref[0]


def _batch_tile(b):
    """Lane-dense batch tile: multiple of 128, capped at MAX_BATCH_TILE."""
    bp128 = max(128, ((b + 127) // 128) * 128)
    return min(bp128, MAX_BATCH_TILE)


def indirect_net_forward(x, params):
    """Full IndirectNet.forward: generate weights + 3-layer MLP, one pallas_call."""
    B = x.shape[0]
    tile = _batch_tile(B)
    bp = ((B + tile - 1) // tile) * tile
    steps = bp // tile

    # batch on lanes: (B,1) -> (1, bp) padded with zeros (padded lanes sliced off)
    x_row = x.reshape(1, B)
    if bp != B:
        x_row = jnp.pad(x_row, ((0, 0), (0, bp - B)))

    # ---- wrapper-side parameter packing (layout plumbing only, <10 KB) ----
    r = np.arange(HIDDEN)
    i_idx = r // OUT_SIZE                                     # which embedding (0..4)
    c_idx = r % OUT_SIZE                                      # which hyper_w chunk (0..7)

    # E (40,128): block-diagonal placement of the embeddings
    emb_rows = params["embeddings"][i_idx]                    # (40, 16)
    onehot_c = jnp.zeros((HIDDEN, OUT_SIZE), jnp.float32)
    onehot_c = onehot_c.at[np.arange(HIDDEN), c_idx].set(1.0) # (40, 8)
    E = (onehot_c[:, :, None] * emb_rows[:, None, :]).reshape(HIDDEN, GEN_K)

    # W (128,40): hyper_w permuted so W[c*16+z, k] = hyper_w[c*40+k, z]
    W = jnp.transpose(params["hyper_w"].reshape(OUT_SIZE, UNIT_DIM, Z_DIM),
                      (0, 2, 1)).reshape(GEN_K, UNIT_DIM)

    # B (40,40): hyper_b in gw layout, B[r,k] = hyper_b[(r%8)*40 + k]
    Bias = params["hyper_b"].reshape(OUT_SIZE, UNIT_DIM)[c_idx]             # (40, 40)

    # small vectors as (40,1) columns packed side by side + w2 as a row
    vec = jnp.stack([params["w0"].reshape(HIDDEN),
                     params["b0"].reshape(HIDDEN),
                     params["b1"].reshape(HIDDEN)], axis=1)                  # (40, 3)
    w2_row = params["w2"].reshape(1, HIDDEN)                                 # (1, 40)
    b2 = params["b2"].reshape(1)                                             # (1,) SMEM

    # ---- honest cost estimate ----
    gen_flops = 2 * HIDDEN * GEN_K * HIDDEN + HIDDEN * HIDDEN   # E@W + bias, per step
    mlp_flops_per_row = 2 * HIDDEN + 2 * HIDDEN * HIDDEN + 2 * HIDDEN
    flops = steps * gen_flops + bp * mlp_flops_per_row
    bytes_accessed = 4 * (2 * bp + E.size + W.size + Bias.size
                          + vec.size + w2_row.size + 1)

    out_row = pl.pallas_call(
        fused_indirect_kernel,
        out_shape=jax.ShapeDtypeStruct((1, bp), jnp.float32),
        grid=(steps,),
        in_specs=[
            pl.BlockSpec((1, tile), lambda i: (0, i)),                        # x
            pl.BlockSpec((HIDDEN, GEN_K), lambda i: (0, 0)),                  # E
            pl.BlockSpec((GEN_K, UNIT_DIM), lambda i: (0, 0)),                # W
            pl.BlockSpec((HIDDEN, HIDDEN), lambda i: (0, 0)),                 # Bias
            pl.BlockSpec((HIDDEN, 3), lambda i: (0, 0)),                      # vec
            pl.BlockSpec((1, HIDDEN), lambda i: (0, 0)),                      # w2
            pl.BlockSpec(memory_space=pltpu.MemorySpace.SMEM),                # b2
        ],
        out_specs=pl.BlockSpec((1, tile), lambda i: (0, i)),
        compiler_params=pltpu.CompilerParams(dimension_semantics=("parallel",)),
        cost_estimate=pl.CostEstimate(flops=flops, transcendentals=0,
                                      bytes_accessed=bytes_accessed),
    )(x_row, E, W, Bias, vec, w2_row, b2)

    return out_row[:, :B].T                                   # (B, 1)


# ---------------------------------------------------------------------------
# Pure-JAX reference (mirrors the PyTorch semantics) for a sanity check.
# ---------------------------------------------------------------------------
def reference_forward(x, params):
    flat = params["embeddings"] @ params["hyper_w"].T + params["hyper_b"]
    gw = flat.reshape(-1)[: HIDDEN * HIDDEN].reshape(HIDDEN, HIDDEN)
    h = jnp.maximum(x @ params["w0"].T + params["b0"], 0.0)
    h = jnp.maximum(h @ gw.T + params["b1"], 0.0)
    return h @ params["w2"].T + params["b2"]


def init_params(key):
    ks = jax.random.split(key, 6)
    bound = np.sqrt(3.0) * np.sqrt(1.0 / (UNIT_DIM * Z_DIM))
    return {
        # HyperNetworkSimple
        "hyper_w": jax.random.uniform(
            ks[0], (OUT_SIZE * UNIT_DIM, Z_DIM), jnp.float32, -bound, bound),
        "hyper_b": jnp.zeros((OUT_SIZE * UNIT_DIM,), jnp.float32),
        # SinusoidHyperGenerator embeddings
        "embeddings": jax.random.normal(ks[1], (N_EMB, Z_DIM), jnp.float32),
        # not_generated layer 0 (1 -> 40), kaiming_normal (fan_in = 1)
        "w0": jax.random.normal(ks[2], (HIDDEN, 1), jnp.float32) * np.sqrt(2.0),
        "b0": jnp.zeros((HIDDEN,), jnp.float32),
        # generated layer 1 bias
        "b1": jnp.zeros((HIDDEN,), jnp.float32),
        # not_generated layer 2 (40 -> 1), kaiming_normal (fan_in = 40)
        "w2": jax.random.normal(ks[3], (1, HIDDEN), jnp.float32) * np.sqrt(2.0 / HIDDEN),
        "b2": jnp.zeros((1,), jnp.float32),
    }


if __name__ == "__main__":
    key = jax.random.PRNGKey(0)
    params = init_params(key)
    x = jax.random.normal(jax.random.PRNGKey(1), (8, 1), jnp.float32)

    out = jax.block_until_ready(indirect_net_forward(x, params))

    ref = reference_forward(x, params)
    np.testing.assert_allclose(np.asarray(out), np.asarray(ref), rtol=1e-4, atol=1e-4)

    print("KERNEL_OK")
</pallas_src>

<mosaic_0001>
module attributes {stable_mosaic.version = 11 : i64} {
  func.func @fused_indirect_kernel(%arg0: i32, %arg1: memref<1x128xf32, #tpu.memory_space<vmem>>, %arg2: memref<40x128xf32, #tpu.memory_space<vmem>>, %arg3: memref<128x40xf32, #tpu.memory_space<vmem>>, %arg4: memref<40x40xf32, #tpu.memory_space<vmem>>, %arg5: memref<40x3xf32, #tpu.memory_space<vmem>>, %arg6: memref<1x40xf32, #tpu.memory_space<vmem>>, %arg7: memref<1xf32, #tpu.memory_space<smem>>, %arg8: memref<1x128xf32, #tpu.memory_space<vmem>>) attributes {dimension_semantics = [#tpu.dimension_semantics<parallel>], iteration_bounds = array<i64: 1>, scalar_prefetch = 0 : i64, scratch_operands = 0 : i64, tpu.core_type = #tpu.core_type<tc>, window_params = [{transform_indices = @transform_0, window_bounds = array<i64: 1, 128>}, {pipeline_mode = #tpu.pipeline_mode<synchronous>, transform_indices = @transform_1, window_bounds = array<i64: 40, 128>}, {pipeline_mode = #tpu.pipeline_mode<synchronous>, transform_indices = @transform_2, window_bounds = array<i64: 128, 40>}, {pipeline_mode = #tpu.pipeline_mode<synchronous>, transform_indices = @transform_3, window_bounds = array<i64: 40, 40>}, {pipeline_mode = #tpu.pipeline_mode<synchronous>, transform_indices = @transform_4, window_bounds = array<i64: 40, 3>}, {pipeline_mode = #tpu.pipeline_mode<synchronous>, transform_indices = @transform_5, window_bounds = array<i64: 1, 40>}, {transform_indices = @transform_6, window_bounds = array<i64: 1>}, {transform_indices = @transform_7, window_bounds = array<i64: 1, 128>}]} {
    %c0 = arith.constant 0 : index
    %c0_0 = arith.constant 0 : index
    %0 = vector.load %arg1[%c0, %c0_0] : memref<1x128xf32, #tpu.memory_space<vmem>>, vector<1x128xf32>
    %c0_1 = arith.constant 0 : index
    %c0_2 = arith.constant 0 : index
    %1 = vector.load %arg5[%c0_1, %c0_2] : memref<40x3xf32, #tpu.memory_space<vmem>>, vector<40x3xf32>
    %2 = vector.extract_strided_slice %1 {offsets = [0, 0], sizes = [40, 1], strides = [1, 1]} : vector<40x3xf32> to vector<40x1xf32>
    %3 = vector.extract_strided_slice %1 {offsets = [0, 1], sizes = [40, 1], strides = [1, 1]} : vector<40x3xf32> to vector<40x1xf32>
    %4 = vector.extract_strided_slice %1 {offsets = [0, 2], sizes = [40, 1], strides = [1, 1]} : vector<40x3xf32> to vector<40x1xf32>
    %c0_3 = arith.constant 0 : index
    %c0_4 = arith.constant 0 : index
    %5 = vector.load %arg2[%c0_3, %c0_4] : memref<40x128xf32, #tpu.memory_space<vmem>>, vector<40x128xf32>
    %c0_5 = arith.constant 0 : index
    %c0_6 = arith.constant 0 : index
    %6 = vector.load %arg3[%c0_5, %c0_6] : memref<128x40xf32, #tpu.memory_space<vmem>>, vector<128x40xf32>
    %cst = arith.constant dense<0.000000e+00> : vector<40x40xf32>
    %7 = tpu.matmul %5, %6, %cst {dimension_numbers = #tpu.dot_dimension_numbers<[1], [0], [0], [1], [0, 0, 1, 1], [], []>} : vector<40x128xf32>, vector<128x40xf32>, vector<40x40xf32> -> vector<40x40xf32>
    %c0_7 = arith.constant 0 : index
    %c0_8 = arith.constant 0 : index
    %8 = vector.load %arg4[%c0_7, %c0_8] : memref<40x40xf32, #tpu.memory_space<vmem>>, vector<40x40xf32>
    %9 = arith.addf %7, %8 : vector<40x40xf32>
    %10 = vector.broadcast %2 : vector<40x1xf32> to vector<40x128xf32>
    %11 = vector.broadcast %0 : vector<1x128xf32> to vector<40x128xf32>
    %12 = arith.mulf %10, %11 : vector<40x128xf32>
    %13 = vector.broadcast %3 : vector<40x1xf32> to vector<40x128xf32>
    %14 = arith.addf %12, %13 : vector<40x128xf32>
    %cst_9 = arith.constant 0.000000e+00 : f32
    %15 = vector.broadcast %cst_9 : f32 to vector<40x128xf32>
    %16 = arith.maximumf %14, %15 : vector<40x128xf32>
    %cst_10 = arith.constant dense<0.000000e+00> : vector<40x128xf32>
    %17 = tpu.matmul %9, %16, %cst_10 {dimension_numbers = #tpu.dot_dimension_numbers<[1], [0], [0], [1], [0, 0, 1, 1], [], []>} : vector<40x40xf32>, vector<40x128xf32>, vector<40x128xf32> -> vector<40x128xf32>
    %18 = vector.broadcast %4 : vector<40x1xf32> to vector<40x128xf32>
    %19 = arith.addf %17, %18 : vector<40x128xf32>
    %cst_11 = arith.constant 0.000000e+00 : f32
    %20 = vector.broadcast %cst_11 : f32 to vector<40x128xf32>
    %21 = arith.maximumf %19, %20 : vector<40x128xf32>
    %c0_12 = arith.constant 0 : index
    %c0_13 = arith.constant 0 : index
    %22 = vector.load %arg6[%c0_12, %c0_13] : memref<1x40xf32, #tpu.memory_space<vmem>>, vector<1x40xf32>
    %cst_14 = arith.constant dense<0.000000e+00> : vector<1x128xf32>
    %23 = tpu.matmul %22, %21, %cst_14 {dimension_numbers = #tpu.dot_dimension_numbers<[1], [0], [0], [1], [0, 0, 1, 1], [], []>} : vector<1x40xf32>, vector<40x128xf32>, vector<1x128xf32> -> vector<1x128xf32>
    %c0_15 = arith.constant 0 : index
    %24 = memref.load %arg7[%c0_15] : memref<1xf32, #tpu.memory_space<smem>>
    %25 = vector.broadcast %24 : f32 to vector<1x128xf32>
    %26 = arith.addf %23, %25 : vector<1x128xf32>
    %c0_16 = arith.constant 0 : index
    %c0_17 = arith.constant 0 : index
    %27 = vector.load %arg8[%c0_16, %c0_17] : memref<1x128xf32, #tpu.memory_space<vmem>>, vector<1x128xf32>
    tpu.vector_store %arg8[%c0_16, %c0_17], %26 {strides = array<i32>} : memref<1x128xf32, #tpu.memory_space<vmem>>, vector<1x128xf32>,
    return
  }
  func.func @transform_0(%arg0: i32) -> (i32, i32) {
    %c0_i32 = arith.constant 0 : i32
    %c0_i32_0 = arith.constant 0 : i32
    return %c0_i32, %arg0 : i32, i32
  }
  func.func @transform_1(%arg0: i32) -> (i32, i32) {
    %c0_i32 = arith.constant 0 : i32
    %c0_i32_0 = arith.constant 0 : i32
    %c0_i32_1 = arith.constant 0 : i32
    return %c0_i32, %c0_i32_0 : i32, i32
  }
  func.func @transform_2(%arg0: i32) -> (i32, i32) {
    %c0_i32 = arith.constant 0 : i32
    %c0_i32_0 = arith.constant 0 : i32
    %c0_i32_1 = arith.constant 0 : i32
    return %c0_i32, %c0_i32_0 : i32, i32
  }
  func.func @transform_3(%arg0: i32) -> (i32, i32) {
    %c0_i32 = arith.constant 0 : i32
    %c0_i32_0 = arith.constant 0 : i32
    %c0_i32_1 = arith.constant 0 : i32
    return %c0_i32, %c0_i32_0 : i32, i32
  }
  func.func @transform_4(%arg0: i32) -> (i32, i32) {
    %c0_i32 = arith.constant 0 : i32
    %c0_i32_0 = arith.constant 0 : i32
    %c0_i32_1 = arith.constant 0 : i32
    return %c0_i32, %c0_i32_0 : i32, i32
  }
  func.func @transform_5(%arg0: i32) -> (i32, i32) {
    %c0_i32 = arith.constant 0 : i32
    %c0_i32_0 = arith.constant 0 : i32
    %c0_i32_1 = arith.constant 0 : i32
    return %c0_i32, %c0_i32_0 : i32, i32
  }
  func.func @transform_6(%arg0: i32) -> i32 {
    %c0_i32 = arith.constant 0 : i32
    %c0_i32_0 = arith.constant 0 : i32
    return %c0_i32 : i32
  }
  func.func @transform_7(%arg0: i32) -> (i32, i32) {
    %c0_i32 = arith.constant 0 : i32
    %c0_i32_0 = arith.constant 0 : i32
    return %c0_i32, %arg0 : i32, i32
  }
}

</mosaic_0001>

<bundles_post_ra>
// kernel: tpu_custom_call.1
= control target key start
LH: loop header
LB: loop body
LE: loop exit
PB: predicated region body
PF: predicated region fallthrough
CT: control target
= control target key end

     0   :  { %v335_v3 = vmov 1   ;;  %v336_v5 = vmov 0   ;;  %s515_s0 = inlined_call_operand.vmem [shape: f32[1,128], index: 0, kind: input, shape index: {}]   ;;  %s516_s1 = inlined_call_operand.vmem [shape: f32[40,128], index: 1, kind: input, shape index: {}]   ;;  %s517_s2 = inlined_call_operand.vmem [shape: f32[128,40], index: 2, kind: input, shape index: {}]   ;;  %s518_s3 = inlined_call_operand.vmem [shape: f32[40,40], index: 3, kind: input, shape index: {}]   ;;  %s519_s4 = inlined_call_operand.vmem [shape: f32[40,3], index: 4, kind: input, shape index: {}]   ;;  %s520_s5 = inlined_call_operand.vmem [shape: f32[1,40], index: 5, kind: input, shape index: {}]   ;;  %s521_s6 = inlined_call_operand.<no memory space> [shape: f32[1], index: 6, kind: input, shape index: {}]   ;;  %s522_s7 = inlined_call_operand.hbm [shape: f32[1,128], index: 7, kind: output, shape index: {}]  }
   0x1   :  { %v54_v0 = vld [vmem:[%s517_s2 + $0x78] sm:$0xff]  ;;  %v385_v1 = vld [vmem:[%s519_s4 + $0x20] sm:$0xff]  ;;  %v53_v2 = vld [vmem:[%s517_s2 + $0x70] sm:$0xff]  ;;  %298 = vset.pattern.permute.xlu1 %v335_v3  ;;  %297 = vset.pattern.permute.xlu0 %v336_v5 }
   0x2   :  { %60 = vmatpush.msra.mxu0 %v54_v0  ;;  %142 = vperm.xlu1 %298, %v385_v1   ;;  %v52_v4 = vld [vmem:[%s517_s2 + $0x68] sm:$0xff]  ;;  %v51_v6 = vld [vmem:[%s517_s2 + $0x60] sm:$0xff]  ;;  %v401_v7 = vld [vmem:[%s519_s4 + $0x18] sm:$0xff] }
   0x3   :  { %114 = vperm.xlu0 %297, %v385_v1   ;;  %277 = vmatpush.msra.mxu3 %v54_v0  ;;  %v50_v8 = vld [vmem:[%s517_s2 + $0x58] sm:$0xff] }
   0x4   :  { %61 = vmatpush.msra.mxu0 %v53_v2  ;;  %300 = vset.pattern.permute.xlu2 %v335_v3 }
   0x5   :  { %138 = vperm.xlu2 %300, %v401_v7   ;;  %278 = vmatpush.msra.mxu3 %v53_v2 }
   0x6   :  { %62 = vmatpush.msra.mxu0 %v52_v4 }
   0x8   :  { %63 = vmatpush.msra.mxu0 %v51_v6 }
   0x9   :  { %13 = vsyncpa [#allocation4], 0  ;;  %v49_v9 = vld [vmem:[%s517_s2 + $0x50] sm:$0xff]  ;;  %279 = vmatpush.msra.mxu3 %v52_v4  ;;  %v48_v11 = vld [vmem:[%s517_s2 + $0x48] sm:$0xff]  ;;  %v337_v40 = vmov 2   ;;  %vm175_vm0 = vcmask 326656  }
   0xa   :  { %v413_v10 = vld [vmem:[%s519_s4 + $0x10] sm:$0xff]  ;;  %64 = vmatpush.msra.mxu0 %v50_v8  ;;  %299 = vset.pattern.permute.xlu1 %v336_v5  ;;  %v422_v12 = vld [vmem:[%s519_s4 + $0x8] sm:$0xff]  ;;  %v47_v13 = vld [vmem:[%s517_s2 + $0x40] sm:$0xff]  ;;  %s338_s17 = smov [#allocation3]   ;;  %s262_s21 = sshll.u32 %s522_s7, 4  ;;  %s263_s21 = int_to_ptr.hbm [resolvable:$true] %s262_s21 }
   0xb   :  { %280 = vmatpush.msra.mxu3 %v51_v6  ;;  %104 = vperm.xlu1 %299, %v413_v10   ;;  %v46_v14 = vld [vmem:[%s517_s2 + $0x38] sm:$0xff]  ;;  %v45_v15 = vld [vmem:[%s517_s2 + $0x30] sm:$0xff]  ;;  %v438_v16 = vld [vmem:[%s519_s4] sm:$0xff]  ;;  %s260_s18 = sshll.u32 %s338_s17, 4  ;;  %s261_s18 = int_to_ptr.vmem [resolvable:$true] %s260_s18 }
   0xc   :  { %65 = vmatpush.msra.mxu0 %v49_v9  ;;  %109 = vperm.xlu0 %297, %v401_v7   ;;  %v44_v17 = vld [vmem:[%s517_s2 + $0x28] sm:$0xff]  ;;  %v43_v18 = vld [vmem:[%s517_s2 + $0x20] sm:$0xff]  ;;  %v42_v19 = vld [vmem:[%s517_s2 + $0x18] sm:$0xff] }
   0xd   :  { %281 = vmatpush.msra.mxu3 %v50_v8  ;;  %301 = vset.pattern.permute.xlu2 %v336_v5  ;;  %v41_v20 = vld [vmem:[%s517_s2 + $0x10] sm:$0xff]  ;;  %v40_v21 = vld [vmem:[%s517_s2 + $0x8] sm:$0xff]  ;;  %v39_v22 = vld [vmem:[%s517_s2] sm:$0xff] }
   0xe   :  { %66 = vmatpush.msra.mxu0 %v48_v11  ;;  %99 = vperm.xlu2 %301, %v422_v12   ;;  %v34_v23 = vld [vmem:[%s516_s1] sm:$0xff]  ;;  %v36_v24 = vld [vmem:[%s516_s1 + $0x10] sm:$0xff]  ;;  %v35_v25 = vld [vmem:[%s516_s1 + $0x8] sm:$0xff] }
   0xf   :  { %282 = vmatpush.msra.mxu3 %v49_v9  ;;  %v37_v26 = vld [vmem:[%s516_s1 + $0x18] sm:$0xff]  ;;  %v38_v27 = vld [vmem:[%s516_s1 + $0x20] sm:$0xff]  ;;  %v56_v58 = vld [vmem:[%s518_s3 + $0x8] sm:$0xff] }
  0x10   :  { %67 = vmatpush.msra.mxu0 %v47_v13  ;;  %v308_v29 = vld [vmem:[%s515_s0] ss:$0 sm:$0xff]  ;;  %v57_v62 = vld [vmem:[%s518_s3 + $0x10] sm:$0xff] }
  0x11   :  { %283 = vmatpush.msra.mxu3 %v48_v11  ;;  %v55_v55 = vld [vmem:[%s518_s3] sm:$0xff] }
  0x12   :  { %68 = vmatpush.msra.mxu0 %v46_v14 }
  0x13   :  { %284 = vmatpush.msra.mxu3 %v47_v13  ;;  %94 = vperm.xlu1 %299, %v438_v16  }
  0x14   :  { %69 = vmatpush.msra.mxu0 %v45_v15  ;;  %302 = vset.pattern.permute.xlu0 %v335_v3 }
  0x15   :  { %285 = vmatpush.msra.mxu3 %v46_v14  ;;  %134 = vperm.xlu0 %302, %v413_v10  }
  0x16   :  { %70 = vmatpush.msra.mxu0 %v44_v17  ;;  %303 = vset.pattern.permute.xlu2 %v335_v3 }
  0x17   :  { %286 = vmatpush.msra.mxu3 %v45_v15  ;;  %130 = vperm.xlu2 %303, %v422_v12  }
  0x18   :  { %71 = vmatpush.msra.mxu0 %v43_v18 }
  0x19   :  { %287 = vmatpush.msra.mxu3 %v44_v17 }
  0x1a   :  { %72 = vmatpush.msra.mxu0 %v42_v19 }
  0x1b   :  { %288 = vmatpush.msra.mxu3 %v43_v18  ;;  %304 = vset.pattern.permute.xlu1 %v335_v3  ;;  %v59_v3 = vld [vmem:[%s518_s3 + $0x20] sm:$0xff] }
  0x1c   :  { %73 = vmatpush.msra.mxu0 %v41_v20  ;;  %126 = vperm.xlu1 %304, %v438_v16  }
  0x1d   :  { %289 = vmatpush.msra.mxu3 %v42_v19  ;;  %306 = vset.pattern.permute.xlu0 %v337_v40 }
  0x1e   :  { %74 = vmatpush.msra.mxu0 %v40_v21  ;;  %168 = vperm.xlu0 %306, %v401_v7  }
  0x1f   :  { %290 = vmatpush.msra.mxu3 %v41_v20  ;;  %305 = vset.pattern.permute.xlu2 %v337_v40 }
  0x20   :  { %75 = vmatpush.msra.mxu0 %v39_v22  ;;  %172 = vperm.xlu2 %305, %v385_v1   ;;  %v58_v1 = vld [vmem:[%s518_s3 + $0x18] sm:$0xff] }
  0x21   :  { %76 = vmatmul.f32.vlgmr.msra.gmra.mxu0 %v34_v23  ;;  %291 = vmatpush.msra.mxu3 %v40_v21 }
  0x23   :  { %292 = vmatpush.msra.mxu3 %v39_v22 }
  0x24   :  { %82 = vmatmul.f32.vlgmr.msra.gmra.mxu3 %v36_v24  ;;  %307 = vset.pattern.permute.xlu1 %v337_v40 }
  0x25   :  { %164 = vperm.xlu1 %307, %v413_v10  }
  0x28   :  { %160 = vperm.xlu2 %305, %v422_v12  }
  0x29   :  { %79 = vmatmul.f32.gmra.mxu0 %v35_v25 }
  0x2c   :  { %85 = vmatmul.f32.gmra.mxu3 %v37_v26  ;;  %v228_v26 = vld [vmem:[%s520_s5] sm:$0x1] }
  0x2d   :  { %156 = vperm.xlu1 %307, %v438_v16  }
  0x34   :  { %88 = vmatmul.f32.gmra.mxu3 %v38_v27  ;;  %v230_v27 = vstv %s521_s6 }
  0x5f   :  { %v139_v28 = vpop.permute.xlu2 %138 }
  0x68   :  { %v100_v34 = vpop.permute.xlu2 %99 }
  0x69   :  { %v121_v41 = vmul.f32 %v308_v29, %v100_v34 }
  0x71   :  { %v131_v43 = vpop.permute.xlu2 %130 }
  0x72   :  { %v146_v46 = vadd.f32 %v131_v43, %v121_v41 }
  0x74   :  { %v143_v30 = vpop.permute.xlu1 %142  ;;  %v151_v50 = vmax.f32 %v146_v46, 0.0 }
  0x75   :  { %v115_v31 = vpop.permute.xlu0 %114 }
  0x76   :  { %v124_v32 = vmul.f32 %v308_v29, %v115_v31 }
  0x78   :  { %v149_v33 = vadd.f32 %v143_v30, %v124_v32 }
  0x7a   :  { %v154_v35 = vmax.f32 %v149_v33, 0.0  ;;  %v173_v9 = vpop.permute.xlu2 %172 }
  0x7c   :  { %202 = vmatpush.msra.mxu1 %v154_v35 }
  0x7d   :  { %v105_v36 = vpop.permute.xlu1 %104 }
  0x7e   :  { %v110_v37 = vpop.permute.xlu0 %109  ;;  %v122_v44 = vmul.f32 %v308_v29, %v105_v36 }
  0x7f   :  { %v123_v38 = vmul.f32 %v308_v29, %v110_v37 }
  0x81   :  { %v148_v39 = vadd.f32 %v139_v28, %v123_v38 }
  0x82   :  { %v161_v16 = vpop.permute.xlu2 %160 }
  0x83   :  { %v153_v42 = vmax.f32 %v148_v39, 0.0 }
  0x85   :  { %v95_v45 = vpop.permute.xlu1 %94  ;;  %203 = vmatpush.msra.mxu1 %v153_v42 }
  0x86   :  { %v120_v51 = vmul.f32 %v308_v29, %v95_v45 }
  0x87   :  { %v135_v47 = vpop.permute.xlu0 %134 }
  0x88   :  { %v147_v48 = vadd.f32 %v135_v47, %v122_v44 }
  0x8a   :  { %v152_v49 = vmax.f32 %v147_v48, 0.0 }
  0x8c   :  { %204 = vmatpush.msra.mxu1 %v152_v49 }
  0x8e   :  { %v127_v52 = vpop.permute.xlu1 %126  ;;  %205 = vmatpush.msra.mxu1 %v151_v50 }
  0x8f   :  { %v145_v53 = vadd.f32 %v127_v52, %v120_v51 }
  0x90   :  { %v169_v12 = vpop.permute.xlu0 %168 }
  0x91   :  { %v150_v54 = vmax.f32 %v145_v53, 0.0 }
  0x93   :  { %206 = vmatpush.msra.mxu1 %v150_v54 }
  0x97   :  { %v165_v11 = vpop.permute.xlu1 %164 }
  0x9e   :  { %v77_v56 = vpop.f32.mrf.mxu0 }
  0x9f   :  { %v78_v57 = vadd.f32 %v77_v56, %v55_v55  ;;  %v157_v19 = vpop.permute.xlu1 %156 }
  0xa1   :  { %271 = vmatmul.msk.f32.vlgmr.msra.gmra.mxu1 %vm175_vm0, %v78_v57 }
  0xa6   :  { %v80_v59 = vpop.f32.mrf.mxu0 }
  0xa7   :  { %v81_v60 = vadd.f32 %v80_v59, %v56_v58  ;;  %v83_v61 = vpop.f32.mrf.mxu3 }
  0xa8   :  { %v84_v63 = vadd.f32 %v83_v61, %v57_v62 }
  0xa9   :  { %272 = vmatmul.msk.f32.gmra.mxu1 %vm175_vm0, %v81_v60 }
  0xaf   :  { %v86_v0 = vpop.f32.mrf.mxu3 }
  0xb0   :  { %v87_v2 = vadd.f32 %v86_v0, %v58_v1 }
  0xb1   :  { %273 = vmatmul.msk.f32.gmra.mxu1 %vm175_vm0, %v84_v63 }
  0xb7   :  { %v89_v4 = vpop.f32.mrf.mxu3 }
  0xb8   :  { %v90_v5 = vadd.f32 %v89_v4, %v59_v3 }
  0xb9   :  { %274 = vmatmul.msk.f32.gmra.mxu1 %vm175_vm0, %v87_v2 }
  0xc1   :  { %275 = vmatmul.msk.f32.gmra.mxu1 %vm175_vm0, %v90_v5 }
 0x11e   :  { %v208_v6 = vpop.f32.mrf.mxu1 }
 0x11f   :  { %v209_v22 = vadd.f32 %v208_v6, %v157_v19 }
 0x121   :  { %v223_v25 = vmax.f32 %v209_v22, 0.0 }
 0x126   :  { %v211_v7 = vpop.f32.mrf.mxu1 }
 0x127   :  { %v212_v20 = vadd.f32 %v211_v7, %v161_v16 }
 0x129   :  { %v224_v24 = vmax.f32 %v212_v20, 0.0 }
 0x12e   :  { %v214_v8 = vpop.f32.mrf.mxu1 }
 0x12f   :  { %v215_v17 = vadd.f32 %v214_v8, %v165_v11 }
 0x131   :  { %v225_v23 = vmax.f32 %v215_v17, 0.0 }
 0x136   :  { %v217_v10 = vpop.f32.mrf.mxu1 }
 0x137   :  { %v218_v14 = vadd.f32 %v217_v10, %v169_v12 }
 0x139   :  { %v226_v21 = vmax.f32 %v218_v14, 0.0 }
 0x13e   :  { %v220_v13 = vpop.f32.mrf.mxu1 }
 0x13f   :  { %v221_v15 = vadd.f32 %v220_v13, %v173_v9 }
 0x141   :  { %v227_v18 = vmax.f32 %v221_v15, 0.0 }
 0x143   :  { %245 = vmatpush.msra.mxu2 %v227_v18 }
 0x145   :  { %246 = vmatpush.msra.mxu2 %v226_v21 }
 0x147   :  { %247 = vmatpush.msra.mxu2 %v225_v23 }
 0x149   :  { %248 = vmatpush.msra.mxu2 %v224_v24 }
 0x14b   :  { %249 = vmatpush.msra.mxu2 %v223_v25 }
 0x14c   :  { %276 = vmatmul.msk.f32.vlgmr.msra.gmra.mxu2 %vm175_vm0, %v228_v26 }
 0x1cf   :  { %v251_v28 = vpop.f32.mrf.mxu2 }
 0x1d0   :  { %v252_v29 = vadd.f32 %v251_v28, %v230_v27 }
 0x1d2   :  { %254 = vst [vmem:[#allocation3] sm:$0x1] %v252_v29 }
 0x1d3   :  { %265 = dma.vmem_to_hbm [thread:$0]  %s261_s18, 16, %s263_s21, [#allocation4]  }
 0x1d4   :  { %333 = dma.done.wait [#allocation4], 16  }
 0x1d5   :  { %334 = vsyncadd [#allocation4], 4294967280 }
 0x1d6   :  { %270 = vsyncpa [#allocation4], 1 }

</bundles_post_ra>
